<compile_context>
chip_gen: v7x
topology: tpu7x:2x2x1
jax: 0.10.0
libtpu: 0.0.40
codegen_flags: <defaults>
</compile_context>

<pallas_src>
import functools

import jax
import jax.numpy as jnp
from jax.experimental import pallas as pl
from jax.experimental.pallas import tpu as pltpu


def _round_up(x, m):
    return ((x + m - 1) // m) * m


def critic_kernel(x_ref, w_ref, v_ref, out_ref):
    """Single-block fused forward.

    x_ref : (N, d_in_p) f32   lane-packed input: state in lanes [0, s_dim),
                              action in [s_dim, d_in), zeros in [d_in, d_in_p)
    w_ref : (Rw, HP)    bf16  packed weight slab:
                                rows [0, d_in)            -> W1 (d_in, HP)
                                rows [d_in, d_in_p)       -> 0  (pad)
                                rows [d_in_p, d_in_p+HP)  -> W2 (HP, HP)
                              (HP = hidden padded to 128 lanes; padding entries 0)
    v_ref : (8, HP)     f32   packed vector slab:
                                row 0: gamma   row 1: beta   (over lanes [0, d_in))
                                row 2: b1      row 3: b2
                                row 4: W3 row  row 5: [b3, 0, ...]
    out_ref: (N, 1) f32
    """
    d_in_p = x_ref.shape[1]
    hp = w_ref.shape[1]

    x = x_ref[...]                                   # (N, d_in_p) f32
    inv_n = 1.0 / x.shape[0]

    # --- BatchNorm1d (training-mode batch stats, biased variance, eps = 1e-5).
    # One pass over the merged lane-packed buffer.  BN is per-feature (per-lane),
    # so this equals per-segment stats of the concatenated input; all-zero pad
    # lanes normalize to exactly 0 (gamma_pad = beta_pad = 0) and the matching
    # W1 pad rows are zero anyway.
    mean = jnp.sum(x, axis=0, keepdims=True) * inv_n
    xc = x - mean
    var = jnp.sum(xc * xc, axis=0, keepdims=True) * inv_n
    scale = v_ref[0:1, 0:d_in_p] * jax.lax.rsqrt(var + 1e-5)   # gamma * inv_std folded
    h = xc * scale + v_ref[1:2, 0:d_in_p]            # (N, d_in_p) f32

    # --- fc1 + relu: single K = d_in_p MXU pass; bf16 operands, f32 accumulation.
    h1 = jnp.dot(h.astype(jnp.bfloat16), w_ref[0:d_in_p, :],
                 preferred_element_type=jnp.float32) + v_ref[2:3, :]
    h1 = jnp.maximum(h1, 0.0)                        # (N, HP), pad lanes stay 0

    # --- fc2 + relu
    h2 = jnp.dot(h1.astype(jnp.bfloat16), w_ref[d_in_p:d_in_p + hp, :],
                 preferred_element_type=jnp.float32) + v_ref[3:4, :]
    h2 = jnp.maximum(h2, 0.0)                        # (N, HP)

    # --- fc3 (out_dim = 1, identity out_fn): VPU multiply + lane reduction instead
    #     of a 1/128-utilized MXU pass.  W3 and b3 stay in f32.
    o = jnp.sum(h2 * v_ref[4:5, :], axis=-1, keepdims=True) + v_ref[5:6, 0:1]

    # TODO(synk): for large N, store a lane-dense (ceil(N/128), 128) slab instead of
    # a 1-lane column (avoids masked vst.msk partial stores); reshape in the wrapper.
    out_ref[...] = o.astype(out_ref.dtype)


def pack_critic_params(params, s_dim, a_dim, hidden_dim):
    """Pack all parameters into two lane-dense slabs (one bf16, one f32).

    Call this ONCE per parameter update, outside the jitted forward — the slab build
    is a chain of scatter ops that would otherwise cost more than the kernel itself.
    """
    d_in = s_dim + a_dim
    d_in_p = _round_up(d_in, 16)                       # bf16 sublane-tile aligned
    hp = max(128, _round_up(hidden_dim, 128))          # hidden padded to full lanes
    n_rows = _round_up(d_in_p + hp, 16)

    w_slab = jnp.zeros((n_rows, hp), jnp.float32)
    w_slab = w_slab.at[0:d_in, 0:hidden_dim].set(params["w1"])
    w_slab = w_slab.at[d_in_p:d_in_p + hidden_dim, 0:hidden_dim].set(params["w2"])
    w_slab = w_slab.astype(jnp.bfloat16)

    v_slab = jnp.zeros((8, hp), jnp.float32)
    v_slab = v_slab.at[0, 0:d_in].set(params["gamma"][0])
    v_slab = v_slab.at[1, 0:d_in].set(params["beta"][0])
    v_slab = v_slab.at[2, 0:hidden_dim].set(params["b1"][0])
    v_slab = v_slab.at[3, 0:hidden_dim].set(params["b2"][0])
    v_slab = v_slab.at[4, 0:hidden_dim].set(params["w3"][:, 0])   # fc3 weight as row
    v_slab = v_slab.at[5, 0].set(params["b3"][0, 0])
    return w_slab, v_slab


def critic_forward(state, action, w_slab, v_slab, n_agents, hidden_dim):
    """state: (n_agents, B, s_dim), action: (n_agents, B, a_dim)."""
    s_dim = state.shape[-1]
    a_dim = action.shape[-1]
    d_in = s_dim + a_dim
    d_in_p = _round_up(d_in, 16)
    hp = w_slab.shape[1]

    xs = state.reshape(-1, s_dim)
    xa = action.reshape(-1, a_dim)
    n_rows = xs.shape[0]

    # Single lane-packed activation input -> one HBM->VMEM DMA instead of two.
    # Packing 8x24 floats in the wrapper is noise versus per-DMA issue latency.
    if d_in_p > d_in:
        pad = jnp.zeros((n_rows, d_in_p - d_in), jnp.float32)
        x = jnp.concatenate([xs, xa, pad], axis=-1)
    else:
        x = jnp.concatenate([xs, xa], axis=-1)

    vmem = pl.BlockSpec(memory_space=pltpu.MemorySpace.VMEM)

    # Cost estimate from the REAL dims (not padded HP), purely a scheduling hint.
    flops = (2 * n_rows * hidden_dim * (d_in + hidden_dim)   # fc1 + fc2
             + 2 * n_rows * hidden_dim                        # fc3 mul+reduce
             + 6 * n_rows * d_in)                             # batchnorm
    bytes_accessed = 4 * (x.size + v_slab.size + n_rows) + 2 * w_slab.size

    out = pl.pallas_call(
        critic_kernel,
        out_shape=jax.ShapeDtypeStruct((n_rows, 1), jnp.float32),
        in_specs=[vmem, vmem, vmem],
        out_specs=vmem,
        cost_estimate=pl.CostEstimate(
            flops=flops, transcendentals=d_in, bytes_accessed=bytes_accessed),
        # TODO(synk): for large N, split BN into two passes (or feed precomputed
        # per-feature stats), add a 'parallel' row grid axis (>=512-row tiles) so
        # both v7x TensorCores share the work, and size tiles against 64 MiB
        # physical / 32 MiB default scoped VMEM via vmem_limit_bytes.
    )(x, w_slab, v_slab)
    return out.reshape(n_agents, -1, 1)


def init_params(key, input_dim, hidden_dim):
    """Deterministic synthetic parameters (PyTorch-Linear-like uniform init)."""
    ks = jax.random.split(key, 6)

    def lin(kw, kb, fan_in, fan_out):
        bound = 1.0 / jnp.sqrt(jnp.float32(fan_in))
        # stored already transposed: (in, out)
        w = jax.random.uniform(kw, (fan_in, fan_out), jnp.float32, -bound, bound)
        b = jax.random.uniform(kb, (1, fan_out), jnp.float32, -bound, bound)
        return w, b

    w1, b1 = lin(ks[0], ks[1], input_dim, hidden_dim)
    w2, b2 = lin(ks[2], ks[3], hidden_dim, hidden_dim)
    w3, b3 = lin(ks[4], ks[5], hidden_dim, 1)
    return {
        "gamma": jnp.ones((1, input_dim), jnp.float32),   # BatchNorm weight = 1
        "beta": jnp.zeros((1, input_dim), jnp.float32),   # BatchNorm bias = 0
        "w1": w1, "b1": b1,
        "w2": w2, "b2": b2,
        "w3": w3, "b3": b3,
    }


def critic_reference(state, action, params, n_agents):
    """Pure-JAX f32 reference of the same forward, for a correctness check."""
    x = jnp.concatenate([state, action], axis=-1)
    x = x.reshape(-1, x.shape[-1])
    mean = x.mean(axis=0, keepdims=True)
    var = ((x - mean) ** 2).mean(axis=0, keepdims=True)
    h = (x - mean) / jnp.sqrt(var + 1e-5) * params["gamma"] + params["beta"]
    h1 = jax.nn.relu(h @ params["w1"] + params["b1"])
    h2 = jax.nn.relu(h1 @ params["w2"] + params["b2"])
    o = h2 @ params["w3"] + params["b3"]
    return o.reshape(n_agents, -1, 1)


if __name__ == "__main__":
    # Small synthetic problem consistent with the module:
    #   obs_shape=(16,), action_shape=(8,), num_adversaries=2, batch-per-agent=4,
    #   hidden_dim=32.
    s_dim, a_dim = 16, 8
    n_agents, batch = 2, 4
    hidden_dim = 32

    key = jax.random.PRNGKey(0)
    k_state, k_action, k_params = jax.random.split(key, 3)

    state = jax.random.normal(k_state, (n_agents, batch, s_dim), jnp.float32)
    action = jax.random.normal(k_action, (n_agents, batch, a_dim), jnp.float32)
    params = init_params(k_params, s_dim + a_dim, hidden_dim)

    # Slabs built ONCE, outside the jitted forward (hot path never repacks params).
    w_slab, v_slab = pack_critic_params(params, s_dim, a_dim, hidden_dim)

    fwd = jax.jit(critic_forward, static_argnums=(4, 5))
    out = jax.block_until_ready(fwd(state, action, w_slab, v_slab, n_agents, hidden_dim))

    ref = critic_reference(state, action, params, n_agents)
    assert out.shape == (n_agents, batch, 1), out.shape
    # Tolerance loosened vs the pure-f32 reference because fc1/fc2 feed the MXU
    # bf16 operands (f32 accumulation); expected error is O(1e-2) at these scales.
    err = float(jnp.max(jnp.abs(out - ref)))
    assert err < 5e-2, f"mismatch vs f32 reference: max abs err {err}"

    print("KERNEL_OK")
</pallas_src>

<mosaic_0001>
module attributes {stable_mosaic.version = 11 : i64} {
  func.func @critic_kernel(%arg0: memref<8x32xf32, #tpu.memory_space<vmem>>, %arg1: memref<160x128xbf16, #tpu.memory_space<vmem>>, %arg2: memref<8x128xf32, #tpu.memory_space<vmem>>, %arg3: memref<8x1xf32, #tpu.memory_space<vmem>>) attributes {dimension_semantics = [], scalar_prefetch = 0 : i64, scratch_operands = 0 : i64, tpu.core_type = #tpu.core_type<tc>} {
    %c0 = arith.constant 0 : index
    %c0_0 = arith.constant 0 : index
    %0 = vector.load %arg0[%c0, %c0_0] : memref<8x32xf32, #tpu.memory_space<vmem>>, vector<8x32xf32>
    %cst = arith.constant dense<0.000000e+00> : vector<32xf32>
    %1 = vector.multi_reduction <add>, %0, %cst [0] : vector<8x32xf32> to vector<32xf32>
    %2 = vector.shape_cast %1 : vector<32xf32> to vector<1x32xf32>
    %cst_1 = arith.constant 1.250000e-01 : f32
    %3 = vector.broadcast %cst_1 : f32 to vector<1x32xf32>
    %4 = arith.mulf %2, %3 : vector<1x32xf32>
    %5 = vector.broadcast %4 : vector<1x32xf32> to vector<8x32xf32>
    %6 = arith.subf %0, %5 : vector<8x32xf32>
    %7 = arith.mulf %6, %6 : vector<8x32xf32>
    %cst_2 = arith.constant dense<0.000000e+00> : vector<32xf32>
    %8 = vector.multi_reduction <add>, %7, %cst_2 [0] : vector<8x32xf32> to vector<32xf32>
    %9 = vector.shape_cast %8 : vector<32xf32> to vector<1x32xf32>
    %cst_3 = arith.constant 1.250000e-01 : f32
    %10 = vector.broadcast %cst_3 : f32 to vector<1x32xf32>
    %11 = arith.mulf %9, %10 : vector<1x32xf32>
    %c0_4 = arith.constant 0 : index
    %c0_5 = arith.constant 0 : index
    %12 = vector.load %arg2[%c0_4, %c0_5] : memref<8x128xf32, #tpu.memory_space<vmem>>, vector<1x32xf32>
    %cst_6 = arith.constant 9.99999974E-6 : f32
    %13 = vector.broadcast %cst_6 : f32 to vector<1x32xf32>
    %14 = arith.addf %11, %13 : vector<1x32xf32>
    %15 = math.rsqrt %14 : vector<1x32xf32>
    %16 = arith.mulf %12, %15 : vector<1x32xf32>
    %17 = vector.broadcast %16 : vector<1x32xf32> to vector<8x32xf32>
    %18 = arith.mulf %6, %17 : vector<8x32xf32>
    %c1 = arith.constant 1 : index
    %c0_7 = arith.constant 0 : index
    %19 = vector.load %arg2[%c1, %c0_7] : memref<8x128xf32, #tpu.memory_space<vmem>>, vector<1x32xf32>
    %20 = vector.broadcast %19 : vector<1x32xf32> to vector<8x32xf32>
    %21 = arith.addf %18, %20 : vector<8x32xf32>
    %22 = arith.truncf %21 : vector<8x32xf32> to vector<8x32xbf16>
    %c0_8 = arith.constant 0 : index
    %c0_9 = arith.constant 0 : index
    %23 = vector.load %arg1[%c0_8, %c0_9] : memref<160x128xbf16, #tpu.memory_space<vmem>>, vector<32x128xbf16>
    %cst_10 = arith.constant dense<0.000000e+00> : vector<8x128xf32>
    %24 = tpu.matmul %22, %23, %cst_10 {dimension_numbers = #tpu.dot_dimension_numbers<[1], [0], [0], [1], [0, 0, 1, 1], [], []>} : vector<8x32xbf16>, vector<32x128xbf16>, vector<8x128xf32> -> vector<8x128xf32>
    %c2 = arith.constant 2 : index
    %c0_11 = arith.constant 0 : index
    %25 = vector.load %arg2[%c2, %c0_11] : memref<8x128xf32, #tpu.memory_space<vmem>>, vector<1x128xf32>
    %26 = vector.broadcast %25 : vector<1x128xf32> to vector<8x128xf32>
    %27 = arith.addf %24, %26 : vector<8x128xf32>
    %cst_12 = arith.constant 0.000000e+00 : f32
    %28 = vector.broadcast %cst_12 : f32 to vector<8x128xf32>
    %29 = arith.maximumf %27, %28 : vector<8x128xf32>
    %30 = arith.truncf %29 : vector<8x128xf32> to vector<8x128xbf16>
    %c32 = arith.constant 32 : index
    %c0_13 = arith.constant 0 : index
    %31 = vector.load %arg1[%c32, %c0_13] : memref<160x128xbf16, #tpu.memory_space<vmem>>, vector<128x128xbf16>
    %cst_14 = arith.constant dense<0.000000e+00> : vector<8x128xf32>
    %32 = tpu.matmul %30, %31, %cst_14 {dimension_numbers = #tpu.dot_dimension_numbers<[1], [0], [0], [1], [0, 0, 1, 1], [], []>} : vector<8x128xbf16>, vector<128x128xbf16>, vector<8x128xf32> -> vector<8x128xf32>
    %c3 = arith.constant 3 : index
    %c0_15 = arith.constant 0 : index
    %33 = vector.load %arg2[%c3, %c0_15] : memref<8x128xf32, #tpu.memory_space<vmem>>, vector<1x128xf32>
    %34 = vector.broadcast %33 : vector<1x128xf32> to vector<8x128xf32>
    %35 = arith.addf %32, %34 : vector<8x128xf32>
    %cst_16 = arith.constant 0.000000e+00 : f32
    %36 = vector.broadcast %cst_16 : f32 to vector<8x128xf32>
    %37 = arith.maximumf %35, %36 : vector<8x128xf32>
    %c4 = arith.constant 4 : index
    %c0_17 = arith.constant 0 : index
    %38 = vector.load %arg2[%c4, %c0_17] : memref<8x128xf32, #tpu.memory_space<vmem>>, vector<1x128xf32>
    %39 = vector.broadcast %38 : vector<1x128xf32> to vector<8x128xf32>
    %40 = arith.mulf %37, %39 : vector<8x128xf32>
    %cst_18 = arith.constant dense<0.000000e+00> : vector<8xf32>
    %41 = vector.multi_reduction <add>, %40, %cst_18 [1] : vector<8x128xf32> to vector<8xf32>
    %42 = vector.shape_cast %41 : vector<8xf32> to vector<8x1xf32>
    %c5 = arith.constant 5 : index
    %c0_19 = arith.constant 0 : index
    %43 = vector.load %arg2[%c5, %c0_19] : memref<8x128xf32, #tpu.memory_space<vmem>>, vector<1x1xf32>
    %44 = vector.broadcast %43 : vector<1x1xf32> to vector<8x1xf32>
    %45 = arith.addf %42, %44 : vector<8x1xf32>
    %c0_20 = arith.constant 0 : index
    %c0_21 = arith.constant 0 : index
    %46 = vector.load %arg3[%c0_20, %c0_21] : memref<8x1xf32, #tpu.memory_space<vmem>>, vector<8x1xf32>
    tpu.vector_store %arg3[%c0_20, %c0_21], %45 {strides = array<i32>} : memref<8x1xf32, #tpu.memory_space<vmem>>, vector<8x1xf32>,
    return
  }
}

</mosaic_0001>

<bundles_post_ra>
// kernel: critic_forward.1
= control target key start
LH: loop header
LB: loop body
LE: loop exit
PB: predicated region body
PF: predicated region fallthrough
CT: control target
= control target key end

     0   :  { %8 = vsyncpa [#allocation3], 0  ;;  %s359_s12 = smov [#allocation2]   ;;  %s435_s0 = inlined_call_operand.vmem [shape: f32[8,32], index: 0, kind: input, shape index: {}]   ;;  %s436_s1 = inlined_call_operand.hbm [shape: bf16[160,128], index: 1, kind: input, shape index: {}]   ;;  %s437_s2 = inlined_call_operand.vmem [shape: f32[8,128], index: 2, kind: input, shape index: {}]   ;;  %s438_s3 = inlined_call_operand.vmem [shape: f32[8,1], index: 3, kind: output, shape index: {}]  }
   0x1   :  { %s16_s13 = sshll.u32 %s359_s12, 4  ;;  %s335_s16 = scalar_lea.hbm %s436_s1, 1280  ;;  %s17_s13 = int_to_ptr.vmem [resolvable:$true] %s16_s13 }
   0x2   :  { %p336_p0 = scmp.ne.s32.totalorder %s436_s1, %s335_s16  ;;  %p339_p1 = scmp.lt.u32.totalorder %s335_s16, %s436_s1 }
   0x4   :  { %p341_p2 = pnand %p339_p1, %p336_p0 }
   0x6   :  { %344 = shalt.err (!%p341_p2)
}
   0x7   :  { %s345_s21 = scalar_lea.vmem %s17_s13, 1280  ;;  %p350_p4 = scmp.lt.s32.totalorder %s17_s13, %s17_s13 }
   0x8   :  { %p346_p3 = scmp.ne.s32.totalorder %s17_s13, %s345_s21  ;;  %p351_p5 = scmp.lt.s32.totalorder %s345_s21, %s345_s21 }
   0xa   :  { %p352_p6 = por %p351_p5, %p350_p4 }
   0xc   :  { %p353_p7 = pnand %p352_p6, %p346_p3 }
   0xe   :  { %356 = shalt.err (!%p353_p7)
}
   0xf   :  { %s360_s22 = smov 64   ;;  %s361_s23 = smov 4  }
  0x10   :  { %22 = dma.hbm_to_vmem [thread:$0]  %s436_s1, 1280, %s17_s13, [#allocation3], %s360_s22, %s360_s22, %s361_s23  }
  0x11   :  { %357 = dma.done.wait [#allocation3], 1280  }
  0x12   :  { %358 = vsyncadd [#allocation3], 4294966016  ;;  %v362_v0 = vmov 0.0   ;;  %vm363_vm0 = vmmov 0   ;;  %v323_v1 = vld [vmem:[#allocation2] sm:$0xff]   ;;  %vm30_vm1 = vcmask 261120   ;;  %v53_v29 = vlaneseq }
  0x13   :  { %290 = vmatprep.subr.bf16.mxu0 %v362_v0  ;;  %294 = vmatprep.mubr.msk.bf16.mxu0 %vm363_vm0, %v362_v0  ;;  %v324_v2 = vld [vmem:[#allocation2 + $0x8] sm:$0xff]   ;;  %v29_v3 = vld [vmem:[%s435_s0] sm:$0xff]  ;;  %v325_v5 = vld [vmem:[#allocation2 + $0x10] sm:$0xff]   ;;  %vm255_vm2 = vcmask 7168  }
  0x14   :  { %298 = vmatprep.subr.bf16.mxu1 %v362_v0  ;;  %314 = vmatprep.mubr.msk.bf16.mxu1 %vm363_vm0, %v362_v0  ;;  %v31_v4 = vsel %vm30_vm1, %v29_v3, 0.0  ;;  %v326_v7 = vld [vmem:[#allocation2 + $0x18] sm:$0xff]   ;;  %v327_v10 = vld [vmem:[#allocation2 + $0x20] sm:$0xff]   ;;  %v328_v13 = vld [vmem:[#allocation2 + $0x28] sm:$0xff]   ;;  %v54_v30 = vshrl.u32 %v53_v29, 7 }
  0x15   :  { %291 = vmatpush3.bf16.msra.mxu0 %v323_v1  ;;  %v32_v6 = vrot.slane %v31_v4, 4  ;;  %299 = vmatpush3.bf16.msra.mxu1 %v325_v5  ;;  %v329_v16 = vld [vmem:[#allocation2 + $0x30] sm:$0xff]   ;;  %v330_v19 = vld [vmem:[#allocation2 + $0x38] sm:$0xff]   ;;  %v49_v31 = vld [vmem:[%s437_s2] sm:$0x1] }
  0x16   :  { %292 = vmatprep.subr.bf16.mxu0 %v362_v0  ;;  %300 = vmatprep.subr.bf16.mxu1 %v362_v0  ;;  %v55_v32 = vsub.s32 0, %v54_v30  ;;  %v262_v36 = vld [vmem:[%s437_s2 + $0x1] ss:$0 sm:$0xff]  ;;  %v332_v41 = vld [vmem:[#allocation2 + $0x48] sm:$0xff]   ;;  %v263_v42 = vld [vmem:[%s437_s2 + $0x2] ss:$0 sm:$0xff] }
  0x17   :  { %v33_v8 = vadd.f32 %v32_v6, %v31_v4  ;;  %v331_v40 = vld [vmem:[#allocation2 + $0x40] sm:$0xff]  }
  0x18   :  { %v267_v50 = vld [vmem:[%s437_s2 + $0x3] ss:$0 sm:$0xff]  ;;  %v276_v55 = vld [vmem:[%s437_s2 + $0x4] ss:$0 sm:$0xff]  ;;  %v277_v59 = vld [vmem:[%s437_s2 + $0x5] ss:$0 sm:$0xff] }
  0x19   :  { %293 = vmatpush3.bf16.msra.mxu0 %v324_v2  ;;  %v34_v9 = vrot.slane %v33_v8, 2  ;;  %301 = vmatpush3.bf16.msra.mxu1 %v326_v7 }
  0x1a   :  { %302 = vmatprep.subr.bf16.mxu1 %v362_v0 }
  0x1b   :  { %v35_v11 = vadd.f32 %v34_v9, %v33_v8 }
  0x1d   :  { %v36_v12 = vrot.slane %v35_v11, 1  ;;  %303 = vmatpush3.bf16.msra.mxu1 %v327_v10 }
  0x1e   :  { %304 = vmatprep.subr.bf16.mxu1 %v362_v0 }
  0x1f   :  { %v37_v14 = vadd.f32 %v36_v12, %v35_v11 }
  0x21   :  { %v38_v15 = vmul.f32 0.125, %v37_v14  ;;  %305 = vmatpush3.bf16.msra.mxu1 %v328_v13 }
  0x22   :  { %306 = vmatprep.subr.bf16.mxu1 %v362_v0 }
  0x23   :  { %v39_v17 = vsub.f32 %v29_v3, %v38_v15 }
  0x25   :  { %v40_v18 = vmul.f32 %v39_v17, %v39_v17  ;;  %307 = vmatpush3.bf16.msra.mxu1 %v329_v16 }
  0x26   :  { %308 = vmatprep.subr.bf16.mxu1 %v362_v0 }
  0x27   :  { %v41_v20 = vsel %vm30_vm1, %v40_v18, 0.0 }
  0x28   :  { %v42_v21 = vrot.slane %v41_v20, 4 }
  0x29   :  { %309 = vmatpush3.bf16.msra.mxu1 %v330_v19 }
  0x2a   :  { %v43_v22 = vadd.f32 %v42_v21, %v41_v20  ;;  %310 = vmatprep.subr.bf16.mxu1 %v362_v0 }
  0x2c   :  { %v44_v23 = vrot.slane %v43_v22, 2 }
  0x2d   :  { %311 = vmatpush3.bf16.msra.mxu1 %v331_v40 }
  0x2e   :  { %v45_v24 = vadd.f32 %v44_v23, %v43_v22  ;;  %312 = vmatprep.subr.bf16.mxu1 %v362_v0 }
  0x30   :  { %v46_v25 = vrot.slane %v45_v24, 1 }
  0x31   :  { %313 = vmatpush3.bf16.msra.mxu1 %v332_v41 }
  0x32   :  { %v47_v26 = vadd.f32 %v46_v25, %v45_v24 }
  0x34   :  { %v48_v27 = vmul.f32 0.125, %v47_v26 }
  0x36   :  { %v50_v28 = vadd.f32 1e-05, %v48_v27 }
  0x38   :  { %333 = vrsqrt.f32 %v50_v28 }
  0x42   :  { %v334_v33 = vpop.eup %333 }
  0x43   :  { %v52_v34 = vmul.f32 %v334_v33, %v49_v31 }
  0x45   :  { %v56_v35 = vrot.slane %v52_v34, %v55_v32 }
  0x47   :  { %v57_v37 = vmul.f32 %v56_v35, %v39_v17 }
  0x49   :  { %v63_v38 = vadd.f32 %v262_v36, %v57_v37 }
  0x4b   :  { %v64_v39 = vpack.c.bf16 %v63_v38, %v63_v38 }
  0x4d   :  { %295 = vmatmul.mubr.msk.bf16.vlgmr.msra.gmra.mrb[0].mxu0 %vm30_vm1, %v64_v39 }
 0x120   :  { %v123_v43 = vpop.f32.mrb[0].mxu0 }
 0x121   :  { %v124_v44 = vadd.f32 %v263_v42, %v123_v43  ;;  %v296_v45 = vpop.f32.mrb[1].mxu0 }
 0x122   :  { %v126_v46 = vpop.f32.mrb[2].mxu0 }
 0x123   :  { %v129_v47 = vmax.f32 %v124_v44, 0.0  ;;  %v297_v48 = vpop.f32.mrb[3].mxu0 }
 0x125   :  { %v130_v49 = vpack.c.bf16 %v129_v47, %v129_v47 }
 0x127   :  { %315 = vmatmul.mubr.bf16.vlgmr.msra.gmra.mrb[0].mxu1 %v130_v49 }
 0x1fa   :  { %v234_v51 = vpop.f32.mrb[0].mxu1 }
 0x1fb   :  { %v235_v52 = vadd.f32 %v267_v50, %v234_v51  ;;  %v316_v53 = vpop.f32.mrb[1].mxu1 }
 0x1fc   :  { %v237_v54 = vpop.f32.mrb[2].mxu1 }
 0x1fd   :  { %v240_v56 = vmax.f32 %v235_v52, 0.0  ;;  %v317_v57 = vpop.f32.mrb[3].mxu1 }
 0x1ff   :  { %v246_v58 = vmul.f32 %v276_v55, %v240_v56 }
 0x201   :  { %247 = vadd.xlane.f32.xlu0 %v246_v58 }
 0x28e   :  { %v248_v60 = vpop.xlane.xlu0 %247 }
 0x28f   :  { %v254_v61 = vadd.f32 %v277_v59, %v248_v60 }
 0x291   :  { %256 = vst.msk [vmem:[%s438_s3] sm:$0xff] %vm255_vm2, %v254_v61 }
 0x292   :  { %261 = vsyncpa [#allocation3], 1 }

</bundles_post_ra>
